<compile_context>
chip_gen: v6e
topology: v6e:2x2x1
jax: 0.10.0
libtpu: 0.0.40
codegen_flags: <defaults>
</compile_context>

<pallas_src>
import jax
import jax.numpy as jnp
from jax.experimental import pallas as pl
from jax.experimental.pallas import tpu as pltpu


def _mse_kernel(inp_ref, tgt_ref, out_ref, num_ref, den_ref):
    # inp_ref/tgt_ref: (bb, th, W) block; out_ref: (1, 128) lane-dense slice
    # owned by batch-block i (resident across the inner H-tile axis j).
    # num_ref/den_ref: (bb, W) f32 scratch carrying partial sums across j.
    j = pl.program_id(1)

    @pl.when(j == 0)
    def _init():
        num_ref[...] = jnp.zeros_like(num_ref)
        den_ref[...] = jnp.zeros_like(den_ref)

    x = inp_ref[...].astype(jnp.float32)
    t = tgt_ref[...].astype(jnp.float32)

    mask = t > 0.0
    diff = jnp.where(mask, x - t, 0.0)
    # den path needs no select: masked-out targets are <= 0 by definition.
    tm = jnp.maximum(t, 0.0)

    # Sublane (H) reduction first -> mostly plain VPU adds across vregs; the
    # expensive cross-lane reduction is deferred to the finalize step below
    # (one per batch element total instead of one per row).
    num_ref[...] += jnp.sum(diff * diff, axis=1)     # (bb, W)
    den_ref[...] += jnp.sum(tm * tm, axis=1)         # (bb, W)

    @pl.when(j == pl.num_programs(1) - 1)
    def _finalize():
        num = jnp.sum(num_ref[...], axis=-1, keepdims=True)   # (bb, 1)
        den = jnp.sum(den_ref[...], axis=-1, keepdims=True)   # (bb, 1)
        # Empty mask  <=>  den == 0 (masked targets strictly positive) -> skip.
        safe_den = jnp.where(den > 0.0, den, 1.0)
        contrib = jnp.where(den > 0.0, num / safe_den, 0.0)   # (bb, 1)
        total = jnp.sum(contrib)                               # scalar partial
        out_ref[...] = jnp.broadcast_to(total, (1, 128)).astype(jnp.float32)


def mse_loss_pallas(inp, tgt, *, target_block_bytes=6 * 1024 * 1024,
                    vmem_limit_bytes=64 * 1024 * 1024):
    """Masked relative MSE. `inp`/`tgt` are (B, H, W); bf16 inputs welcome
    (halves HBM traffic); accumulation is always f32 inside the kernel."""
    assert inp.shape == tgt.shape and inp.ndim == 3
    B, H, W = inp.shape
    itemsize = jnp.dtype(inp.dtype).itemsize

    # ---- Inner H tiling: only when a single (1, H, W) image exceeds the block
    # budget (keeps the double-buffered footprint within v7x's 64 MiB VMEM).
    per_batch_bytes = max(H * W * itemsize, 1)
    if per_batch_bytes <= target_block_bytes or H <= 8:
        th = H
    else:
        cands = [d for d in range(8, H, 8)
                 if H % d == 0 and d * W * itemsize <= target_block_bytes]
        th = max(cands) if cands else H
    ht = H // th
    tile_bytes = max(th * W * itemsize, 1)

    # ---- Batch blocking: blocks sized for the HBM roofline, but keep g >= 2
    # whenever B >= 2 so the "parallel" axis can feed both v7x TensorCores.
    bb = max(1, min(B, target_block_bytes // tile_bytes))
    if B >= 2:
        bb = min(bb, -(-B // 2))
    b_pad = -(-B // bb) * bb
    g = b_pad // bb

    if b_pad > B:
        # Pad with all-zero targets: their mask is empty -> den == 0 -> they
        # contribute exactly 0; we still divide by the original B below.
        pad = ((0, b_pad - B), (0, 0), (0, 0))
        inp = jnp.pad(inp, pad)
        tgt = jnp.pad(tgt, pad)

    out = pl.pallas_call(
        _mse_kernel,
        out_shape=jax.ShapeDtypeStruct((1, g * 128), jnp.float32),
        grid_spec=pltpu.PrefetchScalarGridSpec(
            num_scalar_prefetch=0,
            grid=(g, ht),
            in_specs=[
                pl.BlockSpec((bb, th, W), lambda i, j: (i, j, 0)),
                pl.BlockSpec((bb, th, W), lambda i, j: (i, j, 0)),
            ],
            # Each batch-block owns its own lane-dense 128-wide output slice,
            # resident across the inner (reduction) axis j.
            out_specs=pl.BlockSpec((1, 128), lambda i, j: (0, i)),
            scratch_shapes=[
                pltpu.VMEM((bb, W), jnp.float32),   # carried num partials
                pltpu.VMEM((bb, W), jnp.float32),   # carried den partials
            ],
        ),
        compiler_params=pltpu.CompilerParams(
            dimension_semantics=("parallel", "arbitrary"),
            vmem_limit_bytes=vmem_limit_bytes,
        ),
        cost_estimate=pl.CostEstimate(
            flops=8 * b_pad * H * W,
            transcendentals=0,
            bytes_accessed=2 * b_pad * H * W * itemsize + g * 128 * 4,
        ),
    )(inp, tgt)

    # One partial per batch-block (broadcast across its 128 lanes; read lane 0).
    partial = out.reshape(g, 128)[:, 0]
    return jnp.sum(partial) / jnp.float32(B)


def mse_loss_ref(inp, tgt):
    # Pure-JAX reference mirroring the PyTorch loop.
    x = inp.astype(jnp.float32)
    t = tgt.astype(jnp.float32)
    mask = t > 0.0
    num = jnp.sum(jnp.where(mask, (x - t) ** 2, 0.0), axis=(1, 2))
    den = jnp.sum(jnp.where(mask, t * t, 0.0), axis=(1, 2))
    contrib = jnp.where(den > 0.0, num / jnp.where(den > 0.0, den, 1.0), 0.0)
    return jnp.sum(contrib) / inp.shape[0]


if __name__ == "__main__":
    key = jax.random.PRNGKey(0)
    k1, k2, k3, k4 = jax.random.split(key, 4)

    B, H, W = 4, 16, 128
    inp = jax.random.normal(k1, (B, H, W), dtype=jnp.float32)
    tgt = jax.random.normal(k2, (B, H, W), dtype=jnp.float32)
    # One batch element with an empty mask (all targets <= 0) -> "skip" branch.
    tgt = tgt.at[1].set(-jnp.abs(tgt[1]))
    ref = mse_loss_ref(inp, tgt)

    # Path 1: default blocking (bb=2, g=2, no H tiling) -> parallel batch axis.
    out = mse_loss_pallas(inp, tgt)
    jax.block_until_ready(out)
    assert jnp.allclose(out, ref, rtol=1e-5, atol=1e-6), (out, ref)

    # Path 2: force H tiling (th=8, ht=2, bb=1, g=4) to exercise the carried
    # num/den scratch accumulation and the pl.when init/finalize phases.
    out2 = mse_loss_pallas(inp, tgt, target_block_bytes=H * W * 4 // 2)
    jax.block_until_ready(out2)
    assert jnp.allclose(out2, ref, rtol=1e-5, atol=1e-6), (out2, ref)

    # Path 3: awkward batch (B=5 -> bb=3, padded to 6, g=2) to exercise the
    # zero-target padding path while still dividing by the original B.
    B3 = 5
    inp3 = jax.random.normal(k3, (B3, H, W), dtype=jnp.float32)
    tgt3 = jax.random.normal(k4, (B3, H, W), dtype=jnp.float32)
    ref3 = mse_loss_ref(inp3, tgt3)
    out3 = mse_loss_pallas(inp3, tgt3)
    jax.block_until_ready(out3)
    assert jnp.allclose(out3, ref3, rtol=1e-5, atol=1e-6), (out3, ref3)

    print("KERNEL_OK")
</pallas_src>

<mosaic_0001>
module attributes {stable_mosaic.version = 11 : i64} {
  func.func @_mse_kernel(%arg0: i32, %arg1: i32, %arg2: memref<2x16x128xf32, #tpu.memory_space<vmem>>, %arg3: memref<2x16x128xf32, #tpu.memory_space<vmem>>, %arg4: memref<1x128xf32, #tpu.memory_space<vmem>>, %arg5: memref<2x128xf32, #tpu.memory_space<vmem>>, %arg6: memref<2x128xf32, #tpu.memory_space<vmem>>) attributes {dimension_semantics = [#tpu.dimension_semantics<parallel>, #tpu.dimension_semantics<arbitrary>], iteration_bounds = array<i64: 2, 1>, scalar_prefetch = 0 : i64, scratch_operands = 2 : i64, tpu.core_type = #tpu.core_type<tc>, window_params = [{transform_indices = @transform_0, window_bounds = array<i64: 2, 16, 128>}, {transform_indices = @transform_1, window_bounds = array<i64: 2, 16, 128>}, {transform_indices = @transform_2, window_bounds = array<i64: 1, 128>}]} {
    %c0_i32 = arith.constant 0 : i32
    %0 = arith.cmpi eq, %arg1, %c0_i32 : i32
    %1 = arith.extui %0 : i1 to i32
    %c0_i32_0 = arith.constant 0 : i32
    %2 = arith.cmpi ne, %1, %c0_i32_0 : i32
    scf.if %2 {
      %cst_20 = arith.constant 0.000000e+00 : f32
      %25 = vector.broadcast %cst_20 : f32 to vector<2x128xf32>
      %c0_21 = arith.constant 0 : index
      %c0_22 = arith.constant 0 : index
      %26 = vector.load %arg5[%c0_21, %c0_22] : memref<2x128xf32, #tpu.memory_space<vmem>>, vector<2x128xf32>
      tpu.vector_store %arg5[%c0_21, %c0_22], %25 {strides = array<i32>} : memref<2x128xf32, #tpu.memory_space<vmem>>, vector<2x128xf32>,
      %cst_23 = arith.constant 0.000000e+00 : f32
      %27 = vector.broadcast %cst_23 : f32 to vector<2x128xf32>
      %c0_24 = arith.constant 0 : index
      %c0_25 = arith.constant 0 : index
      %28 = vector.load %arg6[%c0_24, %c0_25] : memref<2x128xf32, #tpu.memory_space<vmem>>, vector<2x128xf32>
      tpu.vector_store %arg6[%c0_24, %c0_25], %27 {strides = array<i32>} : memref<2x128xf32, #tpu.memory_space<vmem>>, vector<2x128xf32>,
    } else {
    }
    %c0 = arith.constant 0 : index
    %c0_1 = arith.constant 0 : index
    %c0_2 = arith.constant 0 : index
    %3 = vector.load %arg2[%c0, %c0_1, %c0_2] : memref<2x16x128xf32, #tpu.memory_space<vmem>>, vector<2x16x128xf32>
    %c0_3 = arith.constant 0 : index
    %c0_4 = arith.constant 0 : index
    %c0_5 = arith.constant 0 : index
    %4 = vector.load %arg3[%c0_3, %c0_4, %c0_5] : memref<2x16x128xf32, #tpu.memory_space<vmem>>, vector<2x16x128xf32>
    %cst = arith.constant 0.000000e+00 : f32
    %5 = vector.broadcast %cst : f32 to vector<2x16x128xf32>
    %6 = arith.cmpf ogt, %4, %5 : vector<2x16x128xf32>
    %7 = arith.subf %3, %4 : vector<2x16x128xf32>
    %cst_6 = arith.constant 0.000000e+00 : f32
    %8 = vector.broadcast %cst_6 : f32 to vector<2x16x128xf32>
    %9 = arith.select %6, %7, %8 : vector<2x16x128xi1>, vector<2x16x128xf32>
    %cst_7 = arith.constant 0.000000e+00 : f32
    %10 = vector.broadcast %cst_7 : f32 to vector<2x16x128xf32>
    %11 = arith.maximumf %4, %10 : vector<2x16x128xf32>
    %c0_8 = arith.constant 0 : index
    %c0_9 = arith.constant 0 : index
    %12 = vector.load %arg5[%c0_8, %c0_9] : memref<2x128xf32, #tpu.memory_space<vmem>>, vector<2x128xf32>
    %13 = arith.mulf %9, %9 : vector<2x16x128xf32>
    %cst_10 = arith.constant dense<0.000000e+00> : vector<2x128xf32>
    %14 = vector.multi_reduction <add>, %13, %cst_10 [1] : vector<2x16x128xf32> to vector<2x128xf32>
    %15 = arith.addf %12, %14 : vector<2x128xf32>
    %c0_11 = arith.constant 0 : index
    %c0_12 = arith.constant 0 : index
    %16 = vector.load %arg5[%c0_11, %c0_12] : memref<2x128xf32, #tpu.memory_space<vmem>>, vector<2x128xf32>
    tpu.vector_store %arg5[%c0_11, %c0_12], %15 {strides = array<i32>} : memref<2x128xf32, #tpu.memory_space<vmem>>, vector<2x128xf32>,
    %c0_13 = arith.constant 0 : index
    %c0_14 = arith.constant 0 : index
    %17 = vector.load %arg6[%c0_13, %c0_14] : memref<2x128xf32, #tpu.memory_space<vmem>>, vector<2x128xf32>
    %18 = arith.mulf %11, %11 : vector<2x16x128xf32>
    %cst_15 = arith.constant dense<0.000000e+00> : vector<2x128xf32>
    %19 = vector.multi_reduction <add>, %18, %cst_15 [1] : vector<2x16x128xf32> to vector<2x128xf32>
    %20 = arith.addf %17, %19 : vector<2x128xf32>
    %c0_16 = arith.constant 0 : index
    %c0_17 = arith.constant 0 : index
    %21 = vector.load %arg6[%c0_16, %c0_17] : memref<2x128xf32, #tpu.memory_space<vmem>>, vector<2x128xf32>
    tpu.vector_store %arg6[%c0_16, %c0_17], %20 {strides = array<i32>} : memref<2x128xf32, #tpu.memory_space<vmem>>, vector<2x128xf32>,
    %c0_i32_18 = arith.constant 0 : i32
    %22 = arith.cmpi eq, %arg1, %c0_i32_18 : i32
    %23 = arith.extui %22 : i1 to i32
    %c0_i32_19 = arith.constant 0 : i32
    %24 = arith.cmpi ne, %23, %c0_i32_19 : i32
    scf.if %24 {
      %c0_20 = arith.constant 0 : index
      %c0_21 = arith.constant 0 : index
      %25 = vector.load %arg5[%c0_20, %c0_21] : memref<2x128xf32, #tpu.memory_space<vmem>>, vector<2x128xf32>
      %cst_22 = arith.constant dense<0.000000e+00> : vector<2xf32>
      %26 = vector.multi_reduction <add>, %25, %cst_22 [1] : vector<2x128xf32> to vector<2xf32>
      %27 = vector.shape_cast %26 : vector<2xf32> to vector<2x1xf32>
      %c0_23 = arith.constant 0 : index
      %c0_24 = arith.constant 0 : index
      %28 = vector.load %arg6[%c0_23, %c0_24] : memref<2x128xf32, #tpu.memory_space<vmem>>, vector<2x128xf32>
      %cst_25 = arith.constant dense<0.000000e+00> : vector<2xf32>
      %29 = vector.multi_reduction <add>, %28, %cst_25 [1] : vector<2x128xf32> to vector<2xf32>
      %30 = vector.shape_cast %29 : vector<2xf32> to vector<2x1xf32>
      %cst_26 = arith.constant 0.000000e+00 : f32
      %31 = vector.broadcast %cst_26 : f32 to vector<2x1xf32>
      %32 = arith.cmpf ogt, %30, %31 : vector<2x1xf32>
      %cst_27 = arith.constant 1.000000e+00 : f32
      %33 = vector.broadcast %cst_27 : f32 to vector<2x1xf32>
      %34 = arith.select %32, %30, %33 : vector<2x1xi1>, vector<2x1xf32>
      %cst_28 = arith.constant 0.000000e+00 : f32
      %35 = vector.broadcast %cst_28 : f32 to vector<2x1xf32>
      %36 = arith.cmpf ogt, %30, %35 : vector<2x1xf32>
      %37 = arith.divf %27, %34 : vector<2x1xf32>
      %cst_29 = arith.constant 0.000000e+00 : f32
      %38 = vector.broadcast %cst_29 : f32 to vector<2x1xf32>
      %39 = arith.select %36, %37, %38 : vector<2x1xi1>, vector<2x1xf32>
      %40 = vector.shape_cast %39 : vector<2x1xf32> to vector<1x2x1xf32>
      %cst_30 = arith.constant dense<0.000000e+00> : vector<1xf32>
      %41 = vector.multi_reduction <add>, %40, %cst_30 [1, 2] : vector<1x2x1xf32> to vector<1xf32>
      %42 = vector.shape_cast %41 : vector<1xf32> to vector<1x1x1xf32>
      %43 = vector.extract %42[0, 0, 0] : f32 from vector<1x1x1xf32>
      %44 = vector.broadcast %43 : f32 to vector<1x128xf32>
      %c0_31 = arith.constant 0 : index
      %c0_32 = arith.constant 0 : index
      %45 = vector.load %arg4[%c0_31, %c0_32] : memref<1x128xf32, #tpu.memory_space<vmem>>, vector<1x128xf32>
      tpu.vector_store %arg4[%c0_31, %c0_32], %44 {strides = array<i32>} : memref<1x128xf32, #tpu.memory_space<vmem>>, vector<1x128xf32>,
    } else {
    }
    return
  }
  func.func @transform_0(%arg0: i32, %arg1: i32) -> (i32, i32, i32) {
    %c0_i32 = arith.constant 0 : i32
    %c0_i32_0 = arith.constant 0 : i32
    return %arg0, %arg1, %c0_i32 : i32, i32, i32
  }
  func.func @transform_1(%arg0: i32, %arg1: i32) -> (i32, i32, i32) {
    %c0_i32 = arith.constant 0 : i32
    %c0_i32_0 = arith.constant 0 : i32
    return %arg0, %arg1, %c0_i32 : i32, i32, i32
  }
  func.func @transform_2(%arg0: i32, %arg1: i32) -> (i32, i32) {
    %c0_i32 = arith.constant 0 : i32
    %c0_i32_0 = arith.constant 0 : i32
    return %c0_i32, %arg0 : i32, i32
  }
}

</mosaic_0001>

<bundles_post_ra>
// kernel: tpu_custom_call.1
= control target key start
LH: loop header
LB: loop body
LE: loop exit
PB: predicated region body
PF: predicated region fallthrough
CT: control target
= control target key end

     0   :  { %7 = vsyncpa [#allocation5], 0  ;;  %s887_s0 = inlined_call_operand.hbm [shape: f32[4,16,128], index: 0, kind: input, shape index: {}]   ;;  %s888_s1 = inlined_call_operand.hbm [shape: f32[4,16,128], index: 1, kind: input, shape index: {}]   ;;  %s889_s2 = inlined_call_operand.hbm [shape: f32[1,256], index: 2, kind: output, shape index: {}]  }
   0x1   :  { %9 = vsyncpa [#allocation5 + $0x1], 0 }
   0x2   :  { %10 = vsyncpa [#allocation8], 0 }
   0x3   :  { %12 = vsyncpa [#allocation8 + $0x1], 0 }
   0x4   :  { %13 = vsyncpa [#allocation6], 0 }
   0x5   :  { %15 = vsyncpa [#allocation6 + $0x1], 0  ;;  %s713_s9 = smov 0   ;;  %s715_s10 = smov 0  }
   0x6   :  { %s717_s11 = smov 0   ;;  %s719_s12 = smov 0  }
   0x7   :  { %s721_s13 = smov 0   ;;  %s723_s14 = smov 0  }
   0x8 LB: > { %s454_s15 = sadd.s32 4294967295, %s690_s14   ;;  %s455_s16 = sadd.s32 4294967294, %s690_s14   ;;  %s690_s14 = sphi %s723_s14, %s21_s14   ;;  %s686_s13 = sphi %s721_s13, %s901_s13   ;;  %s682_s12 = sphi %s719_s12, %s900_s12   ;;  %s678_s11 = sphi %s717_s11, %s899_s11   ;;  %s674_s10 = sphi %s715_s10, %s898_s10   ;;  %s670_s9 = sphi %s713_s9, %s897_s9  }
   0x9   : > { %s33_s17 = sadd.s32 1, %s686_s13  ;;  %s42_s18 = sadd.s32 1, %s678_s11 }
   0xa   : > { %p35_p0 = scmp.ge.s32.totalorder %s33_s17, 2  ;;  %p49_p1 = scmp.ne.s32.totalorder %s678_s11, %s674_s10 }
   0xb   : > { %p50_p2 = scmp.eq.s32.totalorder %s690_s14, 0  ;;  %p55_p3 = scmp.ne.s32.totalorder %s674_s10, %s670_s9 }
   0xc   : > { %s903_s17 = smov (%p35_p0, %s33_s17), 0  ;;  %p56_p5 = scmp.eq.s32.totalorder %s454_s15, 0 }
   0xd   : > { %p754_p4 = por %p50_p2, %p49_p1  ;;  %s37_s20 = ssub.s32 %s686_s13, %s903_s17 }
   0xe   : > { %p107_p6 = scmp.eq.s32.totalorder %s454_s15, 1  ;;  %p40_p7 = scmp.eq.s32.totalorder %s37_s20, 0 }
   0xf   : > { %p760_p8 = por %p56_p5, %p55_p3  ;;  %p113_p10 = scmp.eq.s32.totalorder %s455_s16, 1 }
  0x10   : > { %p764_p9 = por %p107_p6, %p49_p1  ;;  %p495_p13 = scmp.lt.s32.totalorder %s690_s14, 2 }
  0x11   : > { %s769_s23 = scalar_select %p40_p7, %s678_s11, %s42_s18  }
  0x12   : > { %p771_p11 = por %p113_p10, %p55_p3  ;;  %s778_s25 = sand.u32 1, %s678_s11  }
  0x13   : > { %s458_s26 = sshll.u32 %s778_s25, 5  ;;  %s473_s27 = sshll.u32 %s686_s13, 9 }
  0x14   : > { %s146_s30 = scalar_lea.hbm %s887_s0, %s473_s27  ;;  %s137_s3 = scalar_lea.vmem [#allocation4], %s458_s26 }
  0x15   : > { %s147_s4 = sshll.u32 %s137_s3, 4  ;;  %p791_p0 = pnand %p495_p13, %p754_p4  ;;  %s148_s4 = int_to_ptr.vmem [resolvable:$true] %s147_s4 }
  0x16   : > { %p466_p1 = scmp.ge.s32.totalorder %s690_s14, 1  ;;  %s134_s6 = scalar_lea.sflag [#allocation5], %s778_s25 }
  0x17   : > { %p552_p2 = pneg %p791_p0  ;;  %s563_s7 = scalar_lea.vmem %s148_s4, 512 }
  0x18   : > { %p564_p3 = scmp.ne.s32.totalorder %s148_s4, %s563_s7  ;;  %s692_s8 = smov [#allocation4]  }
  0x19   : > { %s568_s15 = sshll.u32 %s692_s8, 4  ;;  %s569_s15 = int_to_ptr.vmem [resolvable:$false] %s568_s15 }
  0x1a   : > { %p566_p5 = pnand %p564_p3, %p552_p2  ;;  %s570_s16 = scalar_lea.vmem %s569_s15, 1024 }
  0x1b   : > { %p571_p4 = scmp.lt.s32.totalorder %s148_s4, %s569_s15  ;;  %p572_p7 = scmp.lt.s32.totalorder %s570_s16, %s563_s7 }
  0x1c   : > { %p567_p6 = pneg %p566_p5 }
  0x1d   : > { %p573_p10 = por %p572_p7, %p571_p4 }
  0x1f   : > { %p574_p13 = pnand %p573_p10, %p567_p6 }
  0x21   : > { %577 = shalt.err (!%p574_p13)
}
  0x22   : > { %s693_s18 = smov 128   ;;  %s694_s19 = smov 8  }
  0x23   : > { %487 = dma.hbm_to_vmem [thread:$0]  (!%p791_p0), %s146_s30, 512, %s148_s4, %s134_s6, %s693_s18, %s693_s18, %s694_s19  }
  0x24   : > { %p179_p3 = scmp.lt.s32.totalorder %s690_s14, 3  ;;  %s170_s29 = scalar_lea.hbm %s888_s1, %s473_s27 }
  0x25   : > { %s161_s7 = scalar_lea.vmem [#allocation7], %s458_s26  ;;  %s158_s15 = scalar_lea.sflag [#allocation8], %s778_s25 }
  0x26   : > { %p812_p5 = pnand %p466_p1, %p179_p3  ;;  %s171_s8 = sshll.u32 %s161_s7, 4  ;;  %s172_s8 = int_to_ptr.vmem [resolvable:$true] %s171_s8 }
  0x27   : > { %s591_s16 = scalar_lea.vmem %s172_s8, 512  ;;  %s695_s30 = smov [#allocation7]  }
  0x28   : > { %p592_p6 = scmp.ne.s32.totalorder %s172_s8, %s591_s16  ;;  %s596_s4 = sshll.u32 %s695_s30, 4  ;;  %s597_s4 = int_to_ptr.vmem [resolvable:$false] %s596_s4 }
  0x29   : > { %s598_s27 = scalar_lea.vmem %s597_s4, 1024  ;;  %p599_p10 = scmp.lt.s32.totalorder %s172_s8, %s597_s4 }
  0x2a   : > { %p594_p4 = pnand %p592_p6, %p552_p2  ;;  %p600_p1 = scmp.lt.s32.totalorder %s598_s27, %s591_s16 }
  0x2c   : > { %p595_p7 = pneg %p594_p4  ;;  %p601_p13 = por %p600_p1, %p599_p10 }
  0x2e   : > { %p602_p3 = pnand %p601_p13, %p595_p7 }
  0x30   : > { %605 = shalt.err (!%p602_p3)
}
  0x31   : > { %490 = dma.hbm_to_vmem [thread:$0]  (!%p791_p0), %s170_s29, 512, %s172_s8, %s158_s15, %s693_s18, %s693_s18, %s694_s19  }
  0x32   : > { %183 = sbr.rel (%p812_p5) target bundleno = 462 (0x1ce), region = 28  ;;  %s827_s25 = sand.u32 (!%p812_p5), 1, %s674_s10  }
  0x33   : > { %s467_s26 = sshll.u32 (!%p812_p5), %s827_s25, 5  ;;  %s186_s6 = scalar_lea.sflag (!%p812_p5), [#allocation5], %s827_s25 }
  0x34   : > { %s189_s20 = scalar_lea.vmem (!%p812_p5), [#allocation4], %s467_s26 }
  0x37   : > { %657 = dma.done.wait (%p760_p8), %s186_s6, 512  }
  0x38   : > { %659 = vsyncadd (%p760_p8), %s186_s6, 4294966784  ;;  %s195_s5 = scalar_lea.sflag [#allocation8], %s827_s25  ;;  %s198_s18 = scalar_lea.vmem [#allocation7], %s467_s26 }
  0x39   : > { %661 = dma.done.wait (%p760_p8), %s195_s5, 512  }
  0x3a   : > { %663 = vsyncadd (%p760_p8), %s195_s5, 4294966784  ;;  %v696_v0 = vmov 0.0   ;;  %v237_v1 = vld [vmem:[%s198_s18] sm:$0xff]  ;;  %v238_v2 = vld [vmem:[%s198_s18 + $0x8] sm:$0xff]  ;;  %vm278_vm4 = vcmask 1041409   ;;  %vm312_vm5 = vcmask 1041408  }
  0x3b   : > { %232 = vst [vmem:[#allocation3] sm:$0x3] %v696_v0  ;;  %231 = vst [vmem:[#allocation2] sm:$0x3] %v696_v0  ;;  %v239_v3 = vld [vmem:[%s198_s18 + $0x10] sm:$0xff]  ;;  %v240_v4 = vld [vmem:[%s198_s18 + $0x18] sm:$0xff] }
  0x3c   : > { %v253_v5 = vmax.f32 %v237_v1, 0.0  ;;  %v254_v6 = vmax.f32 %v238_v2, 0.0  ;;  %v255_v7 = vmax.f32 %v239_v3, 0.0  ;;  %v256_v8 = vmax.f32 %v240_v4, 0.0  ;;  %v233_v9 = vld [vmem:[%s189_s20] sm:$0xff]  ;;  %v234_v10 = vld [vmem:[%s189_s20 + $0x8] sm:$0xff] }
  0x3d   : > { %v235_v11 = vld [vmem:[%s189_s20 + $0x10] sm:$0xff]  ;;  %vm241_vm0 = vcmp.gt.f32.partialorder %v237_v1, 0.0  ;;  %vm242_vm1 = vcmp.gt.f32.partialorder %v238_v2, 0.0  ;;  %v236_v15 = vld [vmem:[%s189_s20 + $0x18] sm:$0xff]  ;;  %vm243_vm2 = vcmp.gt.f32.partialorder %v239_v3, 0.0  ;;  %vm244_vm3 = vcmp.gt.f32.partialorder %v240_v4, 0.0 }
  0x3e   : > { %v284_v12 = vmul.f32 %v253_v5, %v253_v5  ;;  %v285_v13 = vmul.f32 %v254_v6, %v254_v6  ;;  %v286_v14 = vmul.f32 %v255_v7, %v255_v7  ;;  %v287_v16 = vmul.f32 %v256_v8, %v256_v8  ;;  %s222_s21 = scalar_lea.vmem [#allocation9], %s827_s25  ;;  %s469_s28 = sshll.u32 %s682_s12, 4 }
  0x3f   : > { %v245_v17 = vsub.f32 %v233_v9, %v237_v1  ;;  %v246_v18 = vsub.f32 %v234_v10, %v238_v2  ;;  %v247_v20 = vsub.f32 %v235_v11, %v239_v3  ;;  %v248_v21 = vsub.f32 %v236_v15, %v240_v4  ;;  %s351_s19 = sshll.u32 %s222_s21, 4  ;;  %s349_s8 = scalar_lea.hbm %s889_s2, %s469_s28  ;;  %s842_s19 = int_to_ptr.vmem [resolvable:$true] %s351_s19 }
  0x40   : > { %v288_v19 = vadd.f32 %v285_v13, %v284_v12  ;;  %v295_v22 = vadd.f32 %v287_v16, %v286_v14  ;;  %vm325_vm7 = vcmask 1024   ;;  %s339_s15 = scalar_lea.sflag [#allocation6], %s827_s25  ;;  %s606_s16 = scalar_lea.vmem %s842_s19, 16 }
  0x41   : > { %v249_v23 = vsel %vm241_vm0, %v245_v17, 0.0  ;;  %v250_v24 = vsel %vm242_vm1, %v246_v18, 0.0  ;;  %v251_v26 = vsel %vm243_vm2, %v247_v20, 0.0  ;;  %v252_v27 = vsel %vm244_vm3, %v248_v21, 0.0  ;;  %p607_p8 = scmp.ne.s32.totalorder %s842_s19, %s606_s16  ;;  %s697_s30 = smov [#allocation9]  }
  0x42   : > { %v289_v25 = vrot.slane %v288_v19, 4  ;;  %v258_v28 = vmul.f32 %v249_v23, %v249_v23  ;;  %v296_v29 = vrot.slane %v295_v22, 4  ;;  %v259_v30 = vmul.f32 %v250_v24, %v250_v24  ;;  %v283_v50 = vld [vmem:[#allocation3] sm:$0x3]  ;;  %v257_v58 = vld [vmem:[#allocation2] sm:$0x3] }
  0x43   : > { %v260_v31 = vmul.f32 %v251_v26, %v251_v26  ;;  %v261_v32 = vmul.f32 %v252_v27, %v252_v27  ;;  %p608_p0 = pnand %p607_p8, %p764_p9  ;;  %s610_s12 = sshll.u32 %s697_s30, 4  ;;  %s611_s12 = int_to_ptr.vmem [resolvable:$false] %s610_s12 }
  0x44   : > { %v290_v33 = vadd.f32 %v289_v25, %v288_v19  ;;  %v297_v34 = vadd.f32 %v296_v29, %v295_v22  ;;  %v262_v35 = vadd.f32 %v259_v30, %v258_v28  ;;  %s612_s4 = scalar_lea.vmem %s611_s12, 32  ;;  %p613_p5 = scmp.lt.s32.totalorder %s842_s19, %s611_s12 }
  0x45   : > { %v269_v36 = vadd.f32 %v261_v32, %v260_v31  ;;  %p609_p2 = pneg %p608_p0  ;;  %p614_p6 = scmp.lt.s32.totalorder %s612_s4, %s606_s16 }
  0x46   : > { %v291_v37 = vrot.slane %v290_v33, 2  ;;  %v298_v38 = vrot.slane %v297_v34, 2  ;;  %v263_v39 = vrot.slane %v262_v35, 4 }
  0x47   : > { %v270_v40 = vrot.slane %v269_v36, 4  ;;  %p615_p4 = por %p614_p6, %p613_p5 }
  0x48   : > { %v292_v41 = vadd.f32 %v291_v37, %v290_v33  ;;  %v299_v42 = vadd.f32 %v298_v38, %v297_v34  ;;  %v264_v43 = vadd.f32 %v263_v39, %v262_v35 }
  0x49   : > { %v271_v44 = vadd.f32 %v270_v40, %v269_v36  ;;  %p616_p7 = pnand %p615_p4, %p609_p2 }
  0x4a   : > { %v293_v45 = vrot.slane %v292_v41, 1  ;;  %v300_v46 = vrot.slane %v299_v42, 1  ;;  %v265_v47 = vrot.slane %v264_v43, 2 }
  0x4b   : > { %v272_v48 = vrot.slane %v271_v44, 2 }
  0x4c   : > { %v294_v49 = vadd.f32 %v293_v45, %v292_v41  ;;  %v301_v51 = vadd.f32 %v300_v46, %v299_v42  ;;  %v266_v52 = vadd.f32 %v265_v47, %v264_v43 }
  0x4d   : > { %v273_v53 = vadd.f32 %v272_v48, %v271_v44 }
  0x4e   : > { %v304_v54 = vsel %vm278_vm4, %v301_v51, %v294_v49  ;;  %v267_v55 = vrot.slane %v266_v52, 1 }
  0x4f   : > { %v274_v56 = vrot.slane %v273_v53, 1  ;;  %v306_v57 = vadd.f32 %v304_v54, %v283_v50 }
  0x50   : > { %v268_v59 = vadd.f32 %v267_v55, %v266_v52 }
  0x51   : > { %v275_v60 = vadd.f32 %v274_v56, %v273_v53  ;;  %307 = vst [vmem:[#allocation3] sm:$0x3] %v306_v57 }
  0x53   : > { %v279_v61 = vsel %vm278_vm4, %v275_v60, %v268_v59 }
  0x54   : > { %v281_v62 = vadd.f32 %v279_v61, %v257_v58 }
  0x56   : > { %282 = vst [vmem:[#allocation2] sm:$0x3] %v281_v62 }
  0x58   : > { %v316_v63 = vld [vmem:[#allocation3] sm:$0x3] }
  0x59   : > { %v317_v0 = vsel %vm312_vm5, %v316_v63, 0.0 }
  0x5a   : > { %318 = vadd.xlane.f32.xlu0 %v317_v0 }
  0x5d   : > { %v311_v1 = vld [vmem:[#allocation2] sm:$0x3] }
  0x5e   : > { %v313_v2 = vsel %vm312_vm5, %v311_v1, 0.0 }
  0x5f   : > { %314 = vadd.xlane.f32.xlu0 %v313_v2 }
  0xe3   : > { %v319_v3 = vpop.xlane.xlu0 %318 }
  0xe4   : > { %vm320_vm6 = vcmp.gt.f32.partialorder %v319_v3, 0.0 }
  0xe5   : > { %v321_v4 = vsel %vm320_vm6, %v319_v3, 1.0 }
  0xe6   : > { %548 = vrcp.f32 %v321_v4 }
  0xe8   : > { %v315_v5 = vpop.xlane.xlu0 %314 }
  0xf3   : > { %v549_v6 = vpop.eup %548 }
  0xf4   : > { %v323_v7 = vmul.f32 %v549_v6, %v315_v5 }
  0xf6   : > { %v324_v8 = vsel %vm320_vm6, %v323_v7, 0.0 }
  0xf7   : > { %v326_v9 = vsel %vm325_vm7, %v324_v8, 0.0 }
  0xf8   : > { %327 = vadd.xlane.f32.xlu1 %v326_v9 }
 0x181   : > { %v328_v10 = vpop.xlane.xlu1 %327 }
 0x182   : > { %v329_v11 = vrot.slane %v328_v10, 4 }
 0x184   : > { %v330_v12 = vadd.f32 %v329_v11, %v328_v10 }
 0x186   : > { %v331_v13 = vrot.slane %v330_v12, 2 }
 0x188   : > { %v332_v14 = vadd.f32 %v331_v13, %v330_v12 }
 0x18a   : > { %v333_v15 = vrot.slane %v332_v14, 1 }
 0x18c   : > { %v334_v16 = vadd.f32 %v333_v15, %v332_v14 }
 0x18e   : > { %476 = vpush %v334_v16 }
 0x1bf   : > { %s477_s29 = spop %476 }
 0x1c0   : > { %v336_v17 = vstv %s477_s29 }
 0x1c1   : > { %337 = vst [vmem:[%s222_s21] sm:$0x1] %v336_v17 }
 0x1c2   : > { %619 = shalt.err (!%p616_p7)
}
 0x1c3   : > { %s620_s27 = scalar_lea.hbm %s349_s8, 16  ;;  %s624_s6 = scalar_lea.hbm %s889_s2, 32 }
 0x1c4   : > { %p621_p10 = scmp.ne.s32.totalorder %s349_s8, %s620_s27  ;;  %p625_p3 = scmp.lt.s32.totalorder %s349_s8, %s889_s2 }
 0x1c5   : > { %p626_p8 = scmp.lt.s32.totalorder %s624_s6, %s620_s27 }
 0x1c6   : > { %p622_p1 = pnand %p621_p10, %p764_p9 }
 0x1c7   : > { %p627_p0 = por %p626_p8, %p625_p3 }
 0x1c8   : > { %p623_p13 = pneg %p622_p1 }
 0x1ca   : > { %p628_p12 = pnand %p627_p0, %p623_p13 }
 0x1cc   : > { %631 = shalt.err (!%p628_p12)
}
 0x1cd   : > { %482 = dma.vmem_to_hbm [thread:$0]  (%p764_p9), %s842_s19, 16, %s349_s8, %s339_s15  }
 0x1ce PF: > { %s363_s18 = sand.u32 1, %s670_s9   ;;  %p896_p2 = scmp.ge.s32.totalorder %s690_s14, 2 }
 0x1cf   : > { %s364_s21 = scalar_lea.sflag [#allocation6], %s363_s18 }
 0x1d0   : > { %p492_p5 = pnand %p896_p2, %p771_p11 }
 0x1d2   : > { %p493_p6 = pneg %p492_p5 }
 0x1d4   : > { %665 = dma.done.wait (%p493_p6), %s364_s21, 16  }
 0x1d5   : > { %667 = vsyncadd (%p493_p6), %s364_s21, 4294967280  ;;  %s21_s14 = sadd.s32 1, %s690_s14   ;;  %s897_s9 = smov %s674_s10 }
 0x1d6   : > { %p18_p4 = scmp.ge.s32.totalorder %s21_s14, 4   ;;  %s898_s10 = smov %s678_s11 }
 0x1d7   : > { %s899_s11 = smov %s769_s23  ;;  %s900_s12 = smov %s686_s13 }
 0x1d8   : > { %s901_s13 = smov %s903_s17  ;;  %20 = sbr.rel (!%p18_p4) target bundleno = 8 (0x8), region = 94 }
 0x1dd   :  { %368 = vsyncpa [#allocation5], 1 }
 0x1de   :  { %370 = vsyncpa [#allocation5 + $0x1], 1 }
 0x1df   :  { %371 = vsyncpa [#allocation8], 1 }
 0x1e0   :  { %373 = vsyncpa [#allocation8 + $0x1], 1 }
 0x1e1   :  { %374 = vsyncpa [#allocation6], 1 }
 0x1e2   :  { %376 = vsyncpa [#allocation6 + $0x1], 1 }

</bundles_post_ra>
